<compile_context>
chip_gen: v5e
topology: v5e:2x2
jax: 0.10.0
libtpu: 0.0.40
codegen_flags: <defaults>
</compile_context>

<pallas_src>
import functools
import math

import jax
import jax.numpy as jnp
from jax import lax
from jax.experimental import pallas as pl
from jax.experimental.pallas import tpu as pltpu

LN_EPS = 1e-5                 # torch.nn.LayerNorm default
LANE = 128
VMEM_LIMIT_BYTES = 32 * 1024 * 1024   # portable across v5e/v6e (128 MiB) and v7x (64 MiB)


# ----------------------------------------------------------------------------
# Fused kernel: LayerNorm -> attention sublayer -> (dropout=id) -> residual
# ----------------------------------------------------------------------------
def _sublayer_connection_kernel(x_ref, g_ref, b_ref, wqkv_ref, bqkv_ref,
                                wo_ref, bo_ref, o_ref, *,
                                use_ln, residual, d_real, mxu_dtype):
    blk, T, Dp = x_ref.shape
    x = x_ref[...].astype(jnp.float32)            # (blk, T, Dp); lanes >= d_real are 0

    # ---- LayerNorm over the real d_model (optional), statistics in f32 ----
    if use_ln:
        mu = jnp.sum(x, axis=-1, keepdims=True) * (1.0 / d_real)
        xc = x - mu
        if d_real != Dp:
            lane = lax.broadcasted_iota(jnp.int32, (1, 1, Dp), 2)
            xc = jnp.where(lane < d_real, xc, 0.0)
        var = jnp.sum(xc * xc, axis=-1, keepdims=True) * (1.0 / d_real)
        # gamma/beta are zero in padded lanes -> h stays exactly zero there.
        h = xc * lax.rsqrt(var + LN_EPS) * g_ref[...] + b_ref[...]
    else:
        h = x

    # ---- sublayer: single-head self-attention, fused (and 128-aligned) QKV ----
    rows = blk * T
    h2 = h.reshape(rows, Dp)
    qkv = jnp.dot(h2.astype(mxu_dtype), wqkv_ref[...],
                  preferred_element_type=jnp.float32) + bqkv_ref[...]   # (rows, 3*Dp)

    scale = d_real ** -0.5
    q = (qkv[:, 0 * Dp:1 * Dp] * scale).reshape(blk, T, Dp).astype(mxu_dtype)
    k = qkv[:, 1 * Dp:2 * Dp].reshape(blk, T, Dp).astype(mxu_dtype)
    v = qkv[:, 2 * Dp:3 * Dp].reshape(blk, T, Dp).astype(mxu_dtype)

    # TODO(synk): for large T, replace the (blk, T, T) score tensor with a
    # flash-style K-block loop (lax.fori_loop(..., unroll=True) + online
    # softmax) so the quadratic intermediate never materialises (v7x 64 MiB).
    s = jnp.einsum('hqd,hkd->hqk', q, k,
                   preferred_element_type=jnp.float32)                  # (blk, T, T)
    s = s - jnp.max(s, axis=-1, keepdims=True)
    p = jnp.exp(s)
    p = p * pl.reciprocal(jnp.sum(p, axis=-1, keepdims=True), approx=False)

    ctx = jnp.einsum('hqk,hkd->hqd', p.astype(mxu_dtype), v,
                     preferred_element_type=jnp.float32)                # (blk, T, Dp)
    sub = jnp.dot(ctx.reshape(rows, Dp).astype(mxu_dtype), wo_ref[...],
                  preferred_element_type=jnp.float32) + bo_ref[...]
    sub = sub.reshape(blk, T, Dp)

    # TODO(synk): nn.Dropout is identity here (eval mode); training-mode dropout
    # would use pltpu.prng_seed + pltpu.stateful_bernoulli.
    out = x + sub if residual else sub
    o_ref[...] = out.astype(o_ref.dtype)


# ----------------------------------------------------------------------------
# Wrapper
# ----------------------------------------------------------------------------
def _round_up(x, m):
    return ((x + m - 1) // m) * m


def _choose_block(BN, T, Dp, budget_bytes):
    """Largest head-block that fits the f32 VMEM budget, with >= ~8 grid steps
    when BN allows (pipeline steady state + >=2 blocks per TC on v7x)."""
    per_head = 4 * (4 * T * Dp      # x and out blocks, double-buffered by the pipeline
                    + 3 * T * Dp    # fused qkv intermediate
                    + T * T         # scores / probs
                    + T * Dp)       # ctx
    blk = max(1, min(budget_bytes // per_head, BN // min(BN, 8)))
    while BN % blk:
        blk -= 1
    return int(blk)


def sublayer_connection_forward(params, x, *, residual_connection=True,
                                use_LayerNorm=True, matmul_dtype=None):
    """x: (B, N, T, d_model) -> (B, N, T, d_model)."""
    if not residual_connection and not use_LayerNorm:
        # The reference forward has no branch for this combination (returns None).
        raise ValueError("residual_connection=False, use_LayerNorm=False is undefined")

    B, N, T, D = x.shape
    BN = B * N
    Dp = _round_up(D, LANE)
    if matmul_dtype is None:
        # bf16 MXU operands pay off once the projections are non-trivial;
        # keep f32 for tiny d_model where the matmuls are negligible.
        matmul_dtype = jnp.bfloat16 if D >= 256 else jnp.float32

    # ---- zero-pad params/activations so every last dim is lane-dense (x128) ----
    pad_d = Dp - D
    pad2 = ((0, pad_d), (0, pad_d))
    gamma = jnp.pad(params["ln_gamma"], (0, pad_d)).reshape(1, Dp)
    beta = jnp.pad(params["ln_beta"], (0, pad_d)).reshape(1, Dp)

    wq, wk, wv = jnp.split(params["w_qkv"], 3, axis=1)
    w_qkv = jnp.concatenate(
        [jnp.pad(wq, pad2), jnp.pad(wk, pad2), jnp.pad(wv, pad2)], axis=1
    ).astype(matmul_dtype)                                           # (Dp, 3*Dp)
    bq, bk, bv = jnp.split(params["b_qkv"], 3)
    b_qkv = jnp.concatenate([jnp.pad(bq, (0, pad_d)), jnp.pad(bk, (0, pad_d)),
                             jnp.pad(bv, (0, pad_d))]).reshape(1, 3 * Dp)
    w_out = jnp.pad(params["w_out"], pad2).astype(matmul_dtype)      # (Dp, Dp)
    b_out = jnp.pad(params["b_out"], (0, pad_d)).reshape(1, Dp)

    xf = jnp.pad(x.reshape(BN, T, D), ((0, 0), (0, 0), (0, pad_d)))  # (BN, T, Dp)

    # ---- VMEM-budget-driven block/grid choice ----
    w_itemsize = jnp.dtype(matmul_dtype).itemsize
    weight_bytes = 2 * (Dp * 3 * Dp + Dp * Dp) * w_itemsize          # 2x: default buffering
    block_budget = max(1 << 20, min(12 << 20, VMEM_LIMIT_BYTES // 2 - weight_bytes))
    blk = _choose_block(BN, T, Dp, block_budget)
    grid = (BN // blk,)

    kernel = functools.partial(_sublayer_connection_kernel,
                               use_ln=use_LayerNorm, residual=residual_connection,
                               d_real=D, mxu_dtype=matmul_dtype)

    # TODO(synk): the grid-invariant weight operands are still default
    # double-buffered; pipeline_mode=pl.Buffered(1) would reclaim one buffer.
    out = pl.pallas_call(
        kernel,
        out_shape=jax.ShapeDtypeStruct((BN, T, Dp), x.dtype),
        grid=grid,
        in_specs=[
            pl.BlockSpec((blk, T, Dp), lambda i: (i, 0, 0)),      # x
            pl.BlockSpec((1, Dp), lambda i: (0, 0)),              # gamma
            pl.BlockSpec((1, Dp), lambda i: (0, 0)),              # beta
            pl.BlockSpec((Dp, 3 * Dp), lambda i: (0, 0)),         # fused W_qkv
            pl.BlockSpec((1, 3 * Dp), lambda i: (0, 0)),          # fused b_qkv
            pl.BlockSpec((Dp, Dp), lambda i: (0, 0)),             # W_out
            pl.BlockSpec((1, Dp), lambda i: (0, 0)),              # b_out
        ],
        out_specs=pl.BlockSpec((blk, T, Dp), lambda i: (i, 0, 0)),
        compiler_params=pltpu.CompilerParams(
            dimension_semantics=("parallel",),
            vmem_limit_bytes=VMEM_LIMIT_BYTES),
    )(xf, gamma, beta, w_qkv, b_qkv, w_out, b_out)

    return out[..., :D].reshape(B, N, T, D)


# ----------------------------------------------------------------------------
# Parameters (PyTorch-Linear style init) and pure-JAX reference
# ----------------------------------------------------------------------------
def init_params(key, d_model):
    def lin(k, fan_in, fan_out):
        kw, kb = jax.random.split(k)
        s = 1.0 / math.sqrt(fan_in)
        return (jax.random.uniform(kw, (fan_in, fan_out), jnp.float32, -s, s),
                jax.random.uniform(kb, (fan_out,), jnp.float32, -s, s))

    k1, k2 = jax.random.split(key)
    w_qkv, b_qkv = lin(k1, d_model, 3 * d_model)
    w_out, b_out = lin(k2, d_model, d_model)
    return {
        "ln_gamma": jnp.ones((d_model,), jnp.float32),
        "ln_beta": jnp.zeros((d_model,), jnp.float32),
        "w_qkv": w_qkv, "b_qkv": b_qkv,
        "w_out": w_out, "b_out": b_out,
    }


def reference_forward(params, x, residual_connection, use_LayerNorm):
    D = x.shape[-1]
    if use_LayerNorm:
        mu = jnp.mean(x, axis=-1, keepdims=True)
        var = jnp.mean((x - mu) ** 2, axis=-1, keepdims=True)
        h = (x - mu) / jnp.sqrt(var + LN_EPS) * params["ln_gamma"] + params["ln_beta"]
    else:
        h = x
    qkv = h @ params["w_qkv"] + params["b_qkv"]
    q, k, v = jnp.split(qkv, 3, axis=-1)
    s = jnp.einsum('bntd,bnsd->bnts', q, k) / math.sqrt(D)
    p = jax.nn.softmax(s, axis=-1)
    ctx = jnp.einsum('bnts,bnsd->bntd', p, v)
    sub = ctx @ params["w_out"] + params["b_out"]
    return x + sub if residual_connection else sub


# ----------------------------------------------------------------------------
if __name__ == "__main__":
    key = jax.random.PRNGKey(0)
    kp, kx = jax.random.split(key)

    B, N, T, D = 2, 4, 16, 32          # (batch, N, T, d_model)
    params = init_params(kp, D)
    x = jax.random.normal(kx, (B, N, T, D), jnp.float32)

    # Three defined branches of SublayerConnection.forward (f32 MXU path),
    # plus one run exercising the bf16-MXU-operand path.
    cases = [
        (True, True, jnp.float32, 2e-3),
        (True, False, jnp.float32, 2e-3),
        (False, True, jnp.float32, 2e-3),
        (True, True, jnp.bfloat16, 5e-2),
    ]
    for residual, use_ln, mdt, tol in cases:
        fwd = jax.jit(functools.partial(sublayer_connection_forward,
                                        residual_connection=residual,
                                        use_LayerNorm=use_ln,
                                        matmul_dtype=mdt))
        out = fwd(params, x)
        jax.block_until_ready(out)
        assert out.shape == (B, N, T, D), out.shape
        assert bool(jnp.all(jnp.isfinite(out)))
        ref = reference_forward(params, x, residual, use_ln)
        err = float(jnp.max(jnp.abs(out - ref)))
        assert err < tol, (residual, use_ln, str(mdt), err)

    print("KERNEL_OK")
</pallas_src>

<mosaic_0001>
module attributes {stable_mosaic.version = 11 : i64} {
  func.func @_sublayer_connection_kernel(%arg0: i32, %arg1: memref<1x16x128xf32, #tpu.memory_space<vmem>>, %arg2: memref<1x128xf32, #tpu.memory_space<vmem>>, %arg3: memref<1x128xf32, #tpu.memory_space<vmem>>, %arg4: memref<128x384xf32, #tpu.memory_space<vmem>>, %arg5: memref<1x384xf32, #tpu.memory_space<vmem>>, %arg6: memref<128x128xf32, #tpu.memory_space<vmem>>, %arg7: memref<1x128xf32, #tpu.memory_space<vmem>>, %arg8: memref<1x16x128xf32, #tpu.memory_space<vmem>>) attributes {dimension_semantics = [#tpu.dimension_semantics<parallel>], iteration_bounds = array<i64: 8>, scalar_prefetch = 0 : i64, scratch_operands = 0 : i64, tpu.core_type = #tpu.core_type<tc>, window_params = [{transform_indices = @transform_0, window_bounds = array<i64: 1, 16, 128>}, {pipeline_mode = #tpu.pipeline_mode<synchronous>, transform_indices = @transform_1, window_bounds = array<i64: 1, 128>}, {pipeline_mode = #tpu.pipeline_mode<synchronous>, transform_indices = @transform_2, window_bounds = array<i64: 1, 128>}, {pipeline_mode = #tpu.pipeline_mode<synchronous>, transform_indices = @transform_3, window_bounds = array<i64: 128, 384>}, {pipeline_mode = #tpu.pipeline_mode<synchronous>, transform_indices = @transform_4, window_bounds = array<i64: 1, 384>}, {pipeline_mode = #tpu.pipeline_mode<synchronous>, transform_indices = @transform_5, window_bounds = array<i64: 128, 128>}, {pipeline_mode = #tpu.pipeline_mode<synchronous>, transform_indices = @transform_6, window_bounds = array<i64: 1, 128>}, {transform_indices = @transform_7, window_bounds = array<i64: 1, 16, 128>}]} {
    %c0 = arith.constant 0 : index
    %c0_0 = arith.constant 0 : index
    %c0_1 = arith.constant 0 : index
    %0 = vector.load %arg1[%c0, %c0_0, %c0_1] : memref<1x16x128xf32, #tpu.memory_space<vmem>>, vector<1x16x128xf32>
    %cst = arith.constant dense<0.000000e+00> : vector<1x16xf32>
    %1 = vector.multi_reduction <add>, %0, %cst [2] : vector<1x16x128xf32> to vector<1x16xf32>
    %2 = vector.shape_cast %1 : vector<1x16xf32> to vector<1x16x1xf32>
    %cst_2 = arith.constant 3.125000e-02 : f32
    %3 = vector.broadcast %cst_2 : f32 to vector<1x16x1xf32>
    %4 = arith.mulf %2, %3 : vector<1x16x1xf32>
    %5 = vector.broadcast %4 : vector<1x16x1xf32> to vector<1x16x128xf32>
    %6 = arith.subf %0, %5 : vector<1x16x128xf32>
    %7 = tpu.iota {dimensions = array<i32: 2>} : vector<1x1x128xi32>
    %c32_i32 = arith.constant 32 : i32
    %8 = vector.broadcast %c32_i32 : i32 to vector<1x1x128xi32>
    %9 = arith.cmpi slt, %7, %8 : vector<1x1x128xi32>
    %cst_3 = arith.constant 0.000000e+00 : f32
    %10 = vector.shape_cast %9 : vector<1x1x128xi1> to vector<1x1x128xi1>
    %11 = vector.broadcast %10 : vector<1x1x128xi1> to vector<1x16x128xi1>
    %12 = vector.broadcast %cst_3 : f32 to vector<1x16x128xf32>
    %13 = arith.select %11, %6, %12 : vector<1x16x128xi1>, vector<1x16x128xf32>
    %14 = arith.mulf %13, %13 : vector<1x16x128xf32>
    %cst_4 = arith.constant dense<0.000000e+00> : vector<1x16xf32>
    %15 = vector.multi_reduction <add>, %14, %cst_4 [2] : vector<1x16x128xf32> to vector<1x16xf32>
    %16 = vector.shape_cast %15 : vector<1x16xf32> to vector<1x16x1xf32>
    %cst_5 = arith.constant 3.125000e-02 : f32
    %17 = vector.broadcast %cst_5 : f32 to vector<1x16x1xf32>
    %18 = arith.mulf %16, %17 : vector<1x16x1xf32>
    %cst_6 = arith.constant 9.99999974E-6 : f32
    %19 = vector.broadcast %cst_6 : f32 to vector<1x16x1xf32>
    %20 = arith.addf %18, %19 : vector<1x16x1xf32>
    %21 = math.rsqrt %20 : vector<1x16x1xf32>
    %22 = vector.broadcast %21 : vector<1x16x1xf32> to vector<1x16x128xf32>
    %23 = arith.mulf %13, %22 : vector<1x16x128xf32>
    %c0_7 = arith.constant 0 : index
    %c0_8 = arith.constant 0 : index
    %24 = vector.load %arg2[%c0_7, %c0_8] : memref<1x128xf32, #tpu.memory_space<vmem>>, vector<1x128xf32>
    %25 = vector.shape_cast %24 : vector<1x128xf32> to vector<1x1x128xf32>
    %26 = vector.broadcast %25 : vector<1x1x128xf32> to vector<1x16x128xf32>
    %27 = arith.mulf %23, %26 : vector<1x16x128xf32>
    %c0_9 = arith.constant 0 : index
    %c0_10 = arith.constant 0 : index
    %28 = vector.load %arg3[%c0_9, %c0_10] : memref<1x128xf32, #tpu.memory_space<vmem>>, vector<1x128xf32>
    %29 = vector.shape_cast %28 : vector<1x128xf32> to vector<1x1x128xf32>
    %30 = vector.broadcast %29 : vector<1x1x128xf32> to vector<1x16x128xf32>
    %31 = arith.addf %27, %30 : vector<1x16x128xf32>
    %32 = vector.shape_cast %31 : vector<1x16x128xf32> to vector<16x128xf32>
    %c0_11 = arith.constant 0 : index
    %c0_12 = arith.constant 0 : index
    %33 = vector.load %arg4[%c0_11, %c0_12] : memref<128x384xf32, #tpu.memory_space<vmem>>, vector<128x384xf32>
    %cst_13 = arith.constant dense<0.000000e+00> : vector<16x384xf32>
    %34 = tpu.matmul %32, %33, %cst_13 {dimension_numbers = #tpu.dot_dimension_numbers<[1], [0], [0], [1], [0, 0, 1, 1], [], []>} : vector<16x128xf32>, vector<128x384xf32>, vector<16x384xf32> -> vector<16x384xf32>
    %c0_14 = arith.constant 0 : index
    %c0_15 = arith.constant 0 : index
    %35 = vector.load %arg5[%c0_14, %c0_15] : memref<1x384xf32, #tpu.memory_space<vmem>>, vector<1x384xf32>
    %36 = vector.broadcast %35 : vector<1x384xf32> to vector<16x384xf32>
    %37 = arith.addf %34, %36 : vector<16x384xf32>
    %38 = vector.extract_strided_slice %37 {offsets = [0, 0], sizes = [16, 128], strides = [1, 1]} : vector<16x384xf32> to vector<16x128xf32>
    %cst_16 = arith.constant 0.176776692 : f32
    %39 = vector.broadcast %cst_16 : f32 to vector<16x128xf32>
    %40 = arith.mulf %38, %39 : vector<16x128xf32>
    %41 = vector.shape_cast %40 : vector<16x128xf32> to vector<1x16x128xf32>
    %42 = vector.extract_strided_slice %37 {offsets = [0, 128], sizes = [16, 128], strides = [1, 1]} : vector<16x384xf32> to vector<16x128xf32>
    %43 = vector.shape_cast %42 : vector<16x128xf32> to vector<1x16x128xf32>
    %44 = vector.extract_strided_slice %37 {offsets = [0, 256], sizes = [16, 128], strides = [1, 1]} : vector<16x384xf32> to vector<16x128xf32>
    %45 = vector.shape_cast %44 : vector<16x128xf32> to vector<1x16x128xf32>
    "tpu.trace_start"() <{level = 10 : i32, message = "hqd,hkd->hqk"}> : () -> ()
    %cst_17 = arith.constant dense<0.000000e+00> : vector<1x16x16xf32>
    %46 = tpu.matmul %41, %43, %cst_17 {dimension_numbers = #tpu.dot_dimension_numbers<[2], [2], [1], [1], [0, 0, 0, 1, 1, 1], [0], [0]>} : vector<1x16x128xf32>, vector<1x16x128xf32>, vector<1x16x16xf32> -> vector<1x16x16xf32>
    "tpu.trace_stop"() : () -> ()
    %cst_18 = arith.constant dense<0xFF800000> : vector<1x16xf32>
    %47 = vector.multi_reduction <maximumf>, %46, %cst_18 [2] : vector<1x16x16xf32> to vector<1x16xf32>
    %48 = vector.shape_cast %47 : vector<1x16xf32> to vector<1x16x1xf32>
    %49 = vector.broadcast %48 : vector<1x16x1xf32> to vector<1x16x16xf32>
    %50 = arith.subf %46, %49 : vector<1x16x16xf32>
    %51 = math.exp %50 : vector<1x16x16xf32>
    %cst_19 = arith.constant dense<0.000000e+00> : vector<1x16xf32>
    %52 = vector.multi_reduction <add>, %51, %cst_19 [2] : vector<1x16x16xf32> to vector<1x16xf32>
    %53 = vector.shape_cast %52 : vector<1x16xf32> to vector<1x16x1xf32>
    %54 = tpu.reciprocal %53 : vector<1x16x1xf32> -> vector<1x16x1xf32>
    %55 = vector.broadcast %54 : vector<1x16x1xf32> to vector<1x16x16xf32>
    %56 = arith.mulf %51, %55 : vector<1x16x16xf32>
    "tpu.trace_start"() <{level = 10 : i32, message = "hqk,hkd->hqd"}> : () -> ()
    %cst_20 = arith.constant dense<0.000000e+00> : vector<1x16x128xf32>
    %57 = tpu.matmul %56, %45, %cst_20 {dimension_numbers = #tpu.dot_dimension_numbers<[2], [1], [1], [2], [0, 0, 0, 1, 1, 2], [0], [0]>} : vector<1x16x16xf32>, vector<1x16x128xf32>, vector<1x16x128xf32> -> vector<1x16x128xf32>
    "tpu.trace_stop"() : () -> ()
    %58 = vector.shape_cast %57 : vector<1x16x128xf32> to vector<16x128xf32>
    %c0_21 = arith.constant 0 : index
    %c0_22 = arith.constant 0 : index
    %59 = vector.load %arg6[%c0_21, %c0_22] : memref<128x128xf32, #tpu.memory_space<vmem>>, vector<128x128xf32>
    %cst_23 = arith.constant dense<0.000000e+00> : vector<16x128xf32>
    %60 = tpu.matmul %58, %59, %cst_23 {dimension_numbers = #tpu.dot_dimension_numbers<[1], [0], [0], [1], [0, 0, 1, 1], [], []>} : vector<16x128xf32>, vector<128x128xf32>, vector<16x128xf32> -> vector<16x128xf32>
    %c0_24 = arith.constant 0 : index
    %c0_25 = arith.constant 0 : index
    %61 = vector.load %arg7[%c0_24, %c0_25] : memref<1x128xf32, #tpu.memory_space<vmem>>, vector<1x128xf32>
    %62 = vector.broadcast %61 : vector<1x128xf32> to vector<16x128xf32>
    %63 = arith.addf %60, %62 : vector<16x128xf32>
    %64 = vector.shape_cast %63 : vector<16x128xf32> to vector<1x16x128xf32>
    %65 = arith.addf %0, %64 : vector<1x16x128xf32>
    %c0_26 = arith.constant 0 : index
    %c0_27 = arith.constant 0 : index
    %c0_28 = arith.constant 0 : index
    %66 = vector.load %arg8[%c0_26, %c0_27, %c0_28] : memref<1x16x128xf32, #tpu.memory_space<vmem>>, vector<1x16x128xf32>
    tpu.vector_store %arg8[%c0_26, %c0_27, %c0_28], %65 {strides = array<i32>} : memref<1x16x128xf32, #tpu.memory_space<vmem>>, vector<1x16x128xf32>,
    return
  }
  func.func @transform_0(%arg0: i32) -> (i32, i32, i32) {
    %c0_i32 = arith.constant 0 : i32
    %c0_i32_0 = arith.constant 0 : i32
    %c0_i32_1 = arith.constant 0 : i32
    return %arg0, %c0_i32, %c0_i32_0 : i32, i32, i32
  }
  func.func @transform_1(%arg0: i32) -> (i32, i32) {
    %c0_i32 = arith.constant 0 : i32
    %c0_i32_0 = arith.constant 0 : i32
    %c0_i32_1 = arith.constant 0 : i32
    return %c0_i32, %c0_i32_0 : i32, i32
  }
  func.func @transform_2(%arg0: i32) -> (i32, i32) {
    %c0_i32 = arith.constant 0 : i32
    %c0_i32_0 = arith.constant 0 : i32
    %c0_i32_1 = arith.constant 0 : i32
    return %c0_i32, %c0_i32_0 : i32, i32
  }
  func.func @transform_3(%arg0: i32) -> (i32, i32) {
    %c0_i32 = arith.constant 0 : i32
    %c0_i32_0 = arith.constant 0 : i32
    %c0_i32_1 = arith.constant 0 : i32
    return %c0_i32, %c0_i32_0 : i32, i32
  }
  func.func @transform_4(%arg0: i32) -> (i32, i32) {
    %c0_i32 = arith.constant 0 : i32
    %c0_i32_0 = arith.constant 0 : i32
    %c0_i32_1 = arith.constant 0 : i32
    return %c0_i32, %c0_i32_0 : i32, i32
  }
  func.func @transform_5(%arg0: i32) -> (i32, i32) {
    %c0_i32 = arith.constant 0 : i32
    %c0_i32_0 = arith.constant 0 : i32
    %c0_i32_1 = arith.constant 0 : i32
    return %c0_i32, %c0_i32_0 : i32, i32
  }
  func.func @transform_6(%arg0: i32) -> (i32, i32) {
    %c0_i32 = arith.constant 0 : i32
    %c0_i32_0 = arith.constant 0 : i32
    %c0_i32_1 = arith.constant 0 : i32
    return %c0_i32, %c0_i32_0 : i32, i32
  }
  func.func @transform_7(%arg0: i32) -> (i32, i32, i32) {
    %c0_i32 = arith.constant 0 : i32
    %c0_i32_0 = arith.constant 0 : i32
    %c0_i32_1 = arith.constant 0 : i32
    return %arg0, %c0_i32, %c0_i32_0 : i32, i32, i32
  }
}

</mosaic_0001>

<bundles_post_ra>
// kernel: sublayer_connection_forward.1
= control target key start
LH: loop header
LB: loop body
LE: loop exit
PB: predicated region body
PF: predicated region fallthrough
CT: control target
= control target key end

     0   :  { %12 = vsyncpa [#allocation3], 0  ;;  %s1190_s0 = inlined_call_operand.vmem [shape: f32[8,16,128], index: 0, kind: input, shape index: {}]   ;;  %s1191_s1 = inlined_call_operand.vmem [shape: f32[1,128], index: 1, kind: input, shape index: {}]   ;;  %s1192_s2 = inlined_call_operand.vmem [shape: f32[1,128], index: 2, kind: input, shape index: {}]   ;;  %s1193_s3 = inlined_call_operand.vmem [shape: f32[128,384], index: 3, kind: input, shape index: {}]   ;;  %s1194_s4 = inlined_call_operand.vmem [shape: f32[1,384], index: 4, kind: input, shape index: {}]   ;;  %s1195_s5 = inlined_call_operand.vmem [shape: f32[128,128], index: 5, kind: input, shape index: {}]   ;;  %s1196_s6 = inlined_call_operand.vmem [shape: f32[1,128], index: 6, kind: input, shape index: {}]   ;;  %s1197_s7 = inlined_call_operand.hbm [shape: f32[8,16,128], index: 7, kind: output, shape index: {}]  }
   0x1   :  { %14 = vsyncpa [#allocation3 + $0x1], 0  ;;  %s871_s24 = smov 0   ;;  %s873_s25 = smov 0  }
   0x2   :  { %s875_s26 = smov 0   ;;  %s877_s27 = smov 0  }
   0x3 LB: > { %s892_s28 = sadd.s32 4294967295, %s827_s27   ;;  %s691_s29 = sadd.s32 4294967294, %s827_s27   ;;  %s827_s27 = sphi %s877_s27, %s1203_s27   ;;  %s823_s26 = sphi %s875_s26, %s1202_s26   ;;  %s819_s25 = sphi %s873_s25, %s1201_s25   ;;  %s815_s24 = sphi %s871_s24, %s1200_s24  }
   0x4   : > { %s896_s30 = sadd.s32 1, %s827_s27   ;;  %s179_s8 = sadd.s32 1, %s823_s26 }
   0x5   : > { %s176_s9 = ssub.s32 %s827_s27, %s896_s30  ;;  %p189_p0 = scmp.ne.s32.totalorder %s823_s26, %s819_s25 }
   0x6   : > { %p177_p1 = scmp.eq.s32.totalorder %s176_s9, 0  ;;  %p190_p2 = scmp.eq.s32.totalorder %s892_s28, 7 }
   0x7   : > { %p195_p3 = scmp.ne.s32.totalorder %s819_s25, %s815_s24  ;;  %p196_p4 = scmp.eq.s32.totalorder %s691_s29, 7 }
   0x8   : > { %s907_s10 = scalar_select %p177_p1, %s823_s26, %s179_s8  }
   0x9   : > { %p909_p5 = por %p190_p2, %p189_p0  ;;  %p913_p6 = por %p196_p4, %p195_p3 }
   0xa   : > { %p694_p7 = scmp.ge.s32.totalorder %s827_s27, 1  ;;  %p240_p8 = scmp.lt.s32.totalorder %s827_s27, 9 }
   0xc   : > { %p241_p9 = pnand %p694_p7, %p240_p8 }
   0xd   : > { %p272_p10 = scmp.lt.s32.totalorder (!%p241_p9), %s892_s28, 7  ;;  %s269_s9 = sand.u32 (!%p241_p9), 1, %s819_s25  }
   0xe   : > { %244 = sbr.rel (%p241_p9) target bundleno = 1104 (0x450), region = 48  ;;  %s695_s15 = sshll.u32 (!%p241_p9), %s269_s9, 4 }
   0xf   : > { %s706_s16 = sshll.u32 (!%p241_p9), %s892_s28, 4  ;;  %s614_s23 = scalar_lea.sflag (!%p241_p9), [#allocation3], %s269_s9 }
  0x10   : > { %s625_s20 = scalar_lea.hbm (!%p241_p9), %s1197_s7, %s706_s16 }
  0x11   : > { %s628_s22 = sshll.u32 (!%p241_p9), %s625_s20, 4  ;;  %s629_s22 = int_to_ptr.hbm [resolvable:$true] %s628_s22 }
  0x13   : > { %s273_s13 = scalar_select %p272_p10, %s892_s28, 7  ;;  %v383_v2 = vld [vmem:[%s1193_s3 + $0x168] sm:$0xff]  ;;  %v384_v3 = vld [vmem:[%s1193_s3 + $0x170] sm:$0xff]  ;;  %v385_v4 = vld [vmem:[%s1193_s3 + $0x178] sm:$0xff]  ;;  %v287_v8 = vlaneseq  ;;  %vm488_vm7 = vcmask 130048  }
  0x14   : > { %394 = vmatpush.msra.mxu0 %v383_v2  ;;  %417 = vmatpush.msra.mxu1 %v384_v3  ;;  %v380_v5 = vld [vmem:[%s1193_s3 + $0x150] sm:$0xff]  ;;  %v381_v6 = vld [vmem:[%s1193_s3 + $0x158] sm:$0xff]  ;;  %v382_v7 = vld [vmem:[%s1193_s3 + $0x160] sm:$0xff]  ;;  %s779_s28 = sshra.s32 %s629_s22, 4  ;;  %s780_s28 = int_to_ptr.hbm [resolvable:$true] %s779_s28 }
  0x15   : > { %s705_s14 = sshll.u32 %s273_s13, 4  ;;  %440 = vmatpush.msra.mxu2 %v385_v4  ;;  %v288_v9 = vand.u32 127, %v287_v8  ;;  %v377_v20 = vld [vmem:[%s1193_s3 + $0x138] sm:$0xff]  ;;  %v378_v21 = vld [vmem:[%s1193_s3 + $0x140] sm:$0xff]  ;;  %v379_v22 = vld [vmem:[%s1193_s3 + $0x148] sm:$0xff]  ;;  %s781_s29 = scalar_lea.hbm %s780_s28, 16 }
  0x16   : > { %s276_s17 = scalar_lea.vmem %s1190_s0, %s705_s14  ;;  %395 = vmatpush.msra.mxu0 %v380_v5  ;;  %418 = vmatpush.msra.mxu1 %v381_v6  ;;  %v374_v23 = vld [vmem:[%s1193_s3 + $0x120] sm:$0xff]  ;;  %v375_v24 = vld [vmem:[%s1193_s3 + $0x128] sm:$0xff]  ;;  %v376_v25 = vld [vmem:[%s1193_s3 + $0x130] sm:$0xff]  ;;  %p782_p11 = scmp.ne.s32.totalorder %s780_s28, %s781_s29 }
  0x17   : > { %v924_v0 = vld [vmem:[%s276_s17] sm:$0xff]  ;;  %v927_v1 = vld [vmem:[%s276_s17 + $0x8] sm:$0xff]  ;;  %441 = vmatpush.msra.mxu2 %v382_v7  ;;  %vm289_vm0 = vcmp.lt.s32.totalorder %v288_v9, 32  ;;  %v372_v27 = vld [vmem:[%s1193_s3 + $0x110] sm:$0xff]  ;;  %s271_s17 = scalar_lea.vmem [#allocation2], %s695_s15  ;;  %s785_s14 = scalar_lea.hbm %s1197_s7, 128 }
  0x18   : > { %279 = vadd.xlane.f32.xlu0 %v924_v0  ;;  %396 = vmatpush.msra.mxu0 %v377_v20  ;;  %v371_v26 = vld [vmem:[%s1193_s3 + $0x108] sm:$0xff]  ;;  %v373_v28 = vld [vmem:[%s1193_s3 + $0x118] sm:$0xff]  ;;  %v368_v29 = vld [vmem:[%s1193_s3 + $0xf0] sm:$0xff]  ;;  %s626_s21 = sshll.u32 %s271_s17, 4  ;;  %p783_p12 = pnand %p782_p11, %p909_p5  ;;  %s627_s21 = int_to_ptr.vmem [resolvable:$true] %s626_s21 }
  0x19   : > { %419 = vmatpush.msra.mxu1 %v378_v21  ;;  %442 = vmatpush.msra.mxu2 %v379_v22  ;;  %v369_v30 = vld [vmem:[%s1193_s3 + $0xf8] sm:$0xff]  ;;  %v370_v31 = vld [vmem:[%s1193_s3 + $0x100] sm:$0xff]  ;;  %v367_v34 = vld [vmem:[%s1193_s3 + $0xe8] sm:$0xff]  ;;  %p786_p0 = scmp.lt.s32.totalorder %s780_s28, %s1197_s7  ;;  %p787_p1 = scmp.lt.s32.totalorder %s785_s14, %s781_s29 }
  0x1a   : > { %397 = vmatpush.msra.mxu0 %v374_v23  ;;  %v365_v32 = vld [vmem:[%s1193_s3 + $0xd8] sm:$0xff]  ;;  %v366_v33 = vld [vmem:[%s1193_s3 + $0xe0] sm:$0xff]  ;;  %v363_v36 = vld [vmem:[%s1193_s3 + $0xc8] sm:$0xff]  ;;  %p784_p13 = pneg %p783_p12 }
  0x1b   : > { %420 = vmatpush.msra.mxu1 %v375_v24  ;;  %443 = vmatpush.msra.mxu2 %v376_v25  ;;  %v362_v35 = vld [vmem:[%s1193_s3 + $0xc0] sm:$0xff]  ;;  %v364_v37 = vld [vmem:[%s1193_s3 + $0xd0] sm:$0xff]  ;;  %v359_v38 = vld [vmem:[%s1193_s3 + $0xa8] sm:$0xff]  ;;  %p788_p2 = por %p787_p1, %p786_p0 }
  0x1c   : > { %398 = vmatpush.msra.mxu0 %v371_v26  ;;  %v360_v39 = vld [vmem:[%s1193_s3 + $0xb0] sm:$0xff]  ;;  %v361_v40 = vld [vmem:[%s1193_s3 + $0xb8] sm:$0xff]  ;;  %v358_v43 = vld [vmem:[%s1193_s3 + $0xa0] sm:$0xff] }
  0x1d   : > { %421 = vmatpush.msra.mxu1 %v372_v27  ;;  %444 = vmatpush.msra.mxu2 %v373_v28  ;;  %v356_v41 = vld [vmem:[%s1193_s3 + $0x90] sm:$0xff]  ;;  %v357_v42 = vld [vmem:[%s1193_s3 + $0x98] sm:$0xff]  ;;  %v354_v45 = vld [vmem:[%s1193_s3 + $0x80] sm:$0xff]  ;;  %p789_p3 = pnand %p788_p2, %p784_p13 }
  0x1e   : > { %399 = vmatpush.msra.mxu0 %v368_v29  ;;  %v353_v44 = vld [vmem:[%s1193_s3 + $0x78] sm:$0xff]  ;;  %v355_v46 = vld [vmem:[%s1193_s3 + $0x88] sm:$0xff]  ;;  %v350_v47 = vld [vmem:[%s1193_s3 + $0x60] sm:$0xff] }
  0x1f   : > { %422 = vmatpush.msra.mxu1 %v369_v30  ;;  %445 = vmatpush.msra.mxu2 %v370_v31  ;;  %v351_v48 = vld [vmem:[%s1193_s3 + $0x68] sm:$0xff]  ;;  %v352_v49 = vld [vmem:[%s1193_s3 + $0x70] sm:$0xff]  ;;  %v349_v52 = vld [vmem:[%s1193_s3 + $0x58] sm:$0xff] }
  0x20   : > { %281 = vadd.xlane.f32.xlu0 %v927_v1  ;;  %400 = vmatpush.msra.mxu0 %v365_v32  ;;  %v347_v50 = vld [vmem:[%s1193_s3 + $0x48] sm:$0xff]  ;;  %v348_v51 = vld [vmem:[%s1193_s3 + $0x50] sm:$0xff]  ;;  %v345_v54 = vld [vmem:[%s1193_s3 + $0x38] sm:$0xff] }
  0x21   : > { %423 = vmatpush.msra.mxu1 %v366_v33  ;;  %446 = vmatpush.msra.mxu2 %v367_v34  ;;  %v344_v53 = vld [vmem:[%s1193_s3 + $0x30] sm:$0xff]  ;;  %v346_v55 = vld [vmem:[%s1193_s3 + $0x40] sm:$0xff]  ;;  %v341_v56 = vld [vmem:[%s1193_s3 + $0x18] sm:$0xff] }
  0x22   : > { %401 = vmatpush.msra.mxu0 %v362_v35  ;;  %v342_v57 = vld [vmem:[%s1193_s3 + $0x20] sm:$0xff]  ;;  %v343_v58 = vld [vmem:[%s1193_s3 + $0x28] sm:$0xff]  ;;  %v340_v61 = vld [vmem:[%s1193_s3 + $0x10] sm:$0xff] }
  0x23   : > { %424 = vmatpush.msra.mxu1 %v363_v36  ;;  %447 = vmatpush.msra.mxu2 %v364_v37  ;;  %v338_v59 = vld [vmem:[%s1193_s3] sm:$0xff]  ;;  %v339_v60 = vld [vmem:[%s1193_s3 + $0x8] sm:$0xff] }
  0x24   : > { %402 = vmatpush.msra.mxu0 %v359_v38  ;;  %v751_v20 = vld [vmem:[%s1192_s2] ss:$0 sm:$0xff] }
  0x25   : > { %425 = vmatpush.msra.mxu1 %v360_v39  ;;  %448 = vmatpush.msra.mxu2 %v361_v40  ;;  %v386_v31 = vld [vmem:[%s1194_s4] sm:$0x7] }
  0x26   : > { %403 = vmatpush.msra.mxu0 %v356_v41  ;;  %v389_v32 = vperm.slane %v386_v31, 1  ;;  %v388_v34 = vperm.slane %v386_v31, 0  ;;  %v390_v40 = vperm.slane %v386_v31, 2  ;;  %v568_v31 = vld [vmem:[%s1195_s5 + $0x10] sm:$0xff] }
  0x27   : > { %426 = vmatpush.msra.mxu1 %v357_v42  ;;  %449 = vmatpush.msra.mxu2 %v358_v43 }
  0x28   : > { %404 = vmatpush.msra.mxu0 %v353_v44 }
  0x29   : > { %427 = vmatpush.msra.mxu1 %v354_v45  ;;  %450 = vmatpush.msra.mxu2 %v355_v46 }
  0x2a   : > { %405 = vmatpush.msra.mxu0 %v350_v47 }
  0x2b   : > { %428 = vmatpush.msra.mxu1 %v351_v48  ;;  %451 = vmatpush.msra.mxu2 %v352_v49 }
  0x2c   : > { %406 = vmatpush.msra.mxu0 %v347_v50 }
  0x2d   : > { %429 = vmatpush.msra.mxu1 %v348_v51  ;;  %452 = vmatpush.msra.mxu2 %v349_v52 }
  0x2e   : > { %407 = vmatpush.msra.mxu0 %v344_v53 }
  0x2f   : > { %430 = vmatpush.msra.mxu1 %v345_v54  ;;  %453 = vmatpush.msra.mxu2 %v346_v55 }
  0x30   : > { %408 = vmatpush.msra.mxu0 %v341_v56 }
  0x31   : > { %431 = vmatpush.msra.mxu1 %v342_v57  ;;  %454 = vmatpush.msra.mxu2 %v343_v58 }
  0x32   : > { %409 = vmatpush.msra.mxu0 %v338_v59 }
  0x33   : > { %432 = vmatpush.msra.mxu1 %v339_v60  ;;  %455 = vmatpush.msra.mxu2 %v340_v61  ;;  %v581_v60 = vld [vmem:[%s1195_s5 + $0x78] sm:$0xff]  ;;  %v580_v61 = vld [vmem:[%s1195_s5 + $0x70] sm:$0xff] }
  0x8b   : > { %v280_v10 = vpop.xlane.xlu0 %279 }
  0x8c   : > { %v283_v11 = vmul.f32 0.03125, %v280_v10 }
  0x8e   : > { %v285_v12 = vsub.f32 %v924_v0, %v283_v11 }
  0x90   : > { %v949_v13 = vsel %vm289_vm0, %v285_v12, 0.0 }
  0x91   : > { %v294_v14 = vmul.f32 %v949_v13, %v949_v13 }
  0x93   : > { %296 = vadd.xlane.f32.xlu1 %v294_v14  ;;  %v282_v15 = vpop.xlane.xlu0 %281 }
  0x94   : > { %v284_v16 = vmul.f32 0.03125, %v282_v15  ;;  %v750_v15 = vld [vmem:[%s1191_s1] ss:$0 sm:$0xff] }
  0x96   : > { %v286_v17 = vsub.f32 %v927_v1, %v284_v16 }
  0x98   : > { %v954_v18 = vsel %vm289_vm0, %v286_v17, 0.0 }
  0x99   : > { %v295_v19 = vmul.f32 %v954_v18, %v954_v18 }
  0x9b   : > { %298 = vadd.xlane.f32.xlu1 %v295_v19 }
 0x106   : > { %v297_v62 = vpop.xlane.xlu1 %296 }
 0x107   : > { %v300_v63 = vmul.f32 0.03125, %v297_v62  ;;  %v579_v62 = vld [vmem:[%s1195_s5 + $0x68] sm:$0xff] }
 0x109   : > { %v302_v2 = vadd.f32 1e-05, %v300_v63 }
 0x10b   : > { %753 = vrsqrt.f32 %v302_v2  ;;  %vm310_vm2 = vweird.f32 %v302_v2 }
 0x10e   : > { %v299_v3 = vpop.xlane.xlu1 %298 }
 0x10f   : > { %v301_v4 = vmul.f32 0.03125, %v299_v3  ;;  %v577_v3 = vld [vmem:[%s1195_s5 + $0x58] sm:$0xff] }
 0x111   : > { %v754_v5 = vpop.eup %753  ;;  %v303_v6 = vadd.f32 1e-05, %v301_v4  ;;  %v576_v4 = vld [vmem:[%s1195_s5 + $0x50] sm:$0xff] }
 0x112   : > { %v305_v7 = vmul.f32 %v754_v5, %v302_v2  ;;  %vm311_vm1 = vweird.f32 %v754_v5  ;;  %v578_v2 = vld [vmem:[%s1195_s5 + $0x60] sm:$0xff] }
 0x113   : > { %755 = vrsqrt.f32 %v303_v6  ;;  %vm312_vm3 = vmor %vm310_vm2, %vm311_vm1  ;;  %vm320_vm5 = vweird.f32 %v303_v6 }
 0x114   : > { %v306_v8 = vmul.f32 %v754_v5, %v305_v7 }
 0x116   : > { %v307_v9 = vmul.f32 0.5, %v306_v8 }
 0x118   : > { %v308_v10 = vsub.f32 1.5, %v307_v9  ;;  %v574_v9 = vld [vmem:[%s1195_s5 + $0x40] sm:$0xff] }
 0x119   : > { %v756_v11 = vpop.eup %755 }
 0x11a   : > { %v309_v12 = vmul.f32 %v754_v5, %v308_v10  ;;  %v315_v14 = vmul.f32 %v756_v11, %v303_v6  ;;  %vm321_vm4 = vweird.f32 %v756_v11 }
 0x11b   : > { %vm322_vm6 = vmor %vm320_vm5, %vm321_vm4 }
 0x11c   : > { %v313_v16 = vsel %vm312_vm3, %v754_v5, %v309_v12  ;;  %v316_v17 = vmul.f32 %v756_v11, %v315_v14  ;;  %v575_v5 = vld [vmem:[%s1195_s5 + $0x48] sm:$0xff] }
 0x11d   : > { %v324_v19 = vmul.f32 %v313_v16, %v949_v13  ;;  %v572_v16 = vld [vmem:[%s1195_s5 + $0x30] sm:$0xff] }
 0x11e   : > { %v317_v21 = vmul.f32 0.5, %v316_v17 }
 0x11f   : > { %v330_v22 = vmul.f32 %v750_v15, %v324_v19  ;;  %v571_v19 = vld [vmem:[%s1195_s5 + $0x28] sm:$0xff] }
 0x120   : > { %v318_v23 = vsub.f32 1.5, %v317_v21 }
 0x121   : > { %v336_v24 = vadd.f32 %v751_v20, %v330_v22 }
 0x122   : > { %v319_v25 = vmul.f32 %v756_v11, %v318_v23 }
 0x123   : > { %410 = vmatmul.f32.vlgmr.msra.gmra.mxu0 %v336_v24  ;;  %433 = vmatmul.f32.vlgmr.msra.gmra.mxu1 %v336_v24 }
 0x124   : > { %v323_v26 = vsel %vm322_vm6, %v756_v11, %v319_v25  ;;  %456 = vmatmul.f32.vlgmr.msra.gmra.mxu2 %v336_v24  ;;  %v573_v11 = vld [vmem:[%s1195_s5 + $0x38] sm:$0xff]  ;;  %v570_v24 = vld [vmem:[%s1195_s5 + $0x20] sm:$0xff] }
 0x125   : > { %v325_v27 = vmul.f32 %v323_v26, %v954_v18 }
 0x127   : > { %v331_v28 = vmul.f32 %v750_v15, %v325_v27 }
 0x129   : > { %v337_v13 = vadd.f32 %v751_v20, %v331_v28  ;;  %v569_v28 = vld [vmem:[%s1195_s5 + $0x18] sm:$0xff] }
 0x12b   : > { %413 = vmatmul.f32.gmra.mxu0 %v337_v13  ;;  %436 = vmatmul.f32.gmra.mxu1 %v337_v13 }
 0x12c   : > { %459 = vmatmul.f32.gmra.mxu2 %v337_v13 }
 0x1a0   : > { %v411_v29 = vpop.f32.mrf.mxu0  ;;  %v434_v30 = vpop.f32.mrf.mxu1 }
 0x1a1   : > { %v412_v18 = vadd.f32 %v411_v29, %v388_v34  ;;  %v435_v38 = vadd.f32 %v434_v30, %v389_v32 }
 0x1a3   : > { %v463_v42 = vmul.f32 0.17677669, %v412_v18  ;;  %v566_v18 = vld [vmem:[%s1195_s5] sm:$0xff] }
 0x1a7   : > { %v457_v33 = vpop.f32.mrf.mxu2 }
 0x1a8   : > { %v437_v35 = vpop.f32.mrf.mxu1  ;;  %v414_v37 = vpop.f32.mrf.mxu0  ;;  %v458_v45 = vadd.f32 %v457_v33, %v390_v40  ;;  %v567_v33 = vld [vmem:[%s1195_s5 + $0x8] sm:$0xff] }
 0x1a9   : > { %v438_v36 = vadd.f32 %v437_v35, %v389_v32  ;;  %v415_v39 = vadd.f32 %v414_v37, %v388_v34 }
 0x1ab   : > { %479 = vmatpush.xpose.msrb.mxu0 %v438_v36  ;;  %707 = vmatpush.xpose.msrb.mxu1 %v438_v36  ;;  %v464_v44 = vmul.f32 0.17677669, %v415_v39 }
 0x1af   : > { %v460_v41 = vpop.f32.mrf.mxu2  ;;  %480 = vmatpush.xpose.msrb.mxu0 %v435_v38  ;;  %708 = vmatpush.xpose.msrb.mxu1 %v435_v38 }
 0x1b0   : > { %v461_v43 = vadd.f32 %v460_v41, %v390_v40  ;;  %v752_v40 = vld [vmem:[%s1196_s6] ss:$0 sm:$0xff] }
 0x1b2   : > { %557 = vmatpush.msra.mxu3 %v461_v43  ;;  %481 = vmatmul.f32.vlgmr.msrb.gmra.mxu0 %v463_v42 }
 0x1b3   : > { %484 = vmatmul.f32.vlgmr.msrb.gmra.mxu1 %v464_v44 }
 0x1b4   : > { %558 = vmatpush.msra.mxu3 %v458_v45 }
 0x1b6   : > { %586 = vmatpush.msrb.mxu3 %v581_v60 }
 0x1b8   : > { %587 = vmatpush.msrb.mxu3 %v580_v61 }
 0x1ba   : > { %588 = vmatpush.msrb.mxu3 %v579_v62 }
 0x1bc   : > { %589 = vmatpush.msrb.mxu3 %v578_v2 }
 0x1be   : > { %590 = vmatpush.msrb.mxu3 %v577_v3 }
 0x1c0   : > { %591 = vmatpush.msrb.mxu3 %v576_v4 }
 0x1c2   : > { %592 = vmatpush.msrb.mxu3 %v575_v5 }
 0x1c4   : > { %593 = vmatpush.msrb.mxu3 %v574_v9 }
 0x1c6   : > { %594 = vmatpush.msrb.mxu3 %v573_v11 }
 0x1c8   : > { %595 = vmatpush.msrb.mxu3 %v572_v16 }
 0x1ca   : > { %596 = vmatpush.msrb.mxu3 %v571_v19 }
 0x1cc   : > { %597 = vmatpush.msrb.mxu3 %v570_v24 }
 0x1ce   : > { %598 = vmatpush.msrb.mxu3 %v569_v28 }
 0x1d0   : > { %599 = vmatpush.msrb.mxu3 %v568_v31 }
 0x1d2   : > { %600 = vmatpush.msrb.mxu3 %v567_v33 }
 0x1d4   : > { %601 = vmatpush.msrb.mxu3 %v566_v18 }
 0x22f   : > { %v482_v46 = vpop.f32.mrf.mxu0 }
 0x230   : > { %v489_v47 = vsel %vm488_vm7, %v482_v46, -inf  ;;  %v485_v48 = vpop.f32.mrf.mxu1 }
 0x231   : > { %490 = vmax.xlane.f32.xlu2 %v489_v47  ;;  %v492_v49 = vsel %vm488_vm7, %v485_v48, -inf }
 0x239   : > { %493 = vmax.xlane.f32.xlu2 %v492_v49 }
 0x2a4   : > { %v491_v50 = vpop.xlane.xlu2 %490 }
 0x2a5   : > { %v495_v51 = vsub.f32 %v482_v46, %v491_v50 }
 0x2a7   : > { %v497_v52 = vmul.f32 1.442695, %v495_v51 }
 0x2a9   : > { %757 = vpow2.f32 %v497_v52 }
 0x2ac   : > { %v494_v53 = vpop.xlane.xlu2 %493 }
 0x2ad   : > { %v496_v54 = vsub.f32 %v485_v48, %v494_v53 }
 0x2af   : > { %v758_v55 = vpop.eup %757  ;;  %v499_v56 = vmul.f32 1.442695, %v496_v54 }
 0x2b0   : > { %v501_v57 = vsel %vm488_vm7, %v758_v55, 0.0 }
 0x2b1   : > { %759 = vpow2.f32 %v499_v56  ;;  %502 = vadd.xlane.f32.xlu0 %v501_v57 }
 0x2b7   : > { %v1098_v58 = vpop.eup %759 }
 0x2b8   : > { %v504_v59 = vsel %vm488_vm7, %v1098_v58, 0.0 }
 0x2b9   : > { %505 = vadd.xlane.f32.xlu1 %v504_v59 }
 0x324   : > { %v503_v63 = vpop.xlane.xlu0 %502 }
 0x325   : > { %761 = vrcp.f32 %v503_v63  ;;  %v518_v12 = vand.u32 2147483648, %v503_v63  ;;  %v516_v15 = vand.u32 2147483647, %v503_v63  ;;  %vm512_vm9 = vweird.f32 %v503_v63 }
 0x327   : > { %v519_v21 = vor.u32 1.1754944e-38, %v518_v12  ;;  %vm517_vm11 = vcmp.eq.f32.partialorder %v516_v15, 8.507059e+37 }
 0x32b   : > { %v762_v6 = vpop.eup %761 }
 0x32c   : > { %v508_v7 = vmul.f32 %v762_v6, %v503_v63  ;;  %v506_v8 = vpop.xlane.xlu1 %505  ;;  %vm513_vm8 = vweird.f32 %v762_v6 }
 0x32d   : > { %763 = vrcp.f32 %v506_v8  ;;  %vm514_vm10 = vmor %vm512_vm9, %vm513_vm8  ;;  %v532_v13 = vand.u32 2147483648, %v506_v8  ;;  %v530_v30 = vand.u32 2147483647, %v506_v8  ;;  %vm526_vm13 = vweird.f32 %v506_v8 }
 0x32e   : > { %v509_v10 = vsub.f32 1.0, %v508_v7 }
 0x32f   : > { %v533_v34 = vor.u32 1.1754944e-38, %v532_v13  ;;  %vm531_vm15 = vcmp.eq.f32.partialorder %v530_v30, 8.507059e+37 }
 0x330   : > { %v510_v14 = vmul.f32 %v762_v6, %v509_v10 }
 0x332   : > { %v511_v17 = vadd.f32 %v762_v6, %v510_v14 }
 0x333   : > { %v764_v20 = vpop.eup %763 }
 0x334   : > { %v522_v22 = vmul.f32 %v764_v20, %v506_v8  ;;  %v515_v23 = vsel %vm514_vm10, %v762_v6, %v511_v17  ;;  %vm527_vm12 = vweird.f32 %v764_v20 }
 0x335   : > { %v520_v25 = vsel %vm517_vm11, %v519_v21, %v515_v23  ;;  %vm528_vm14 = vmor %vm526_vm13, %vm527_vm12 }
 0x336   : > { %v523_v26 = vsub.f32 1.0, %v522_v22  ;;  %v535_v27 = vmul.f32 %v758_v55, %v520_v25 }
 0x338   : > { %v524_v29 = vmul.f32 %v764_v20, %v523_v26  ;;  %698 = vmatmul.msk.f32.vlgmr.msra.gmra.mxu3 %vm488_vm7, %v535_v27 }
 0x33a   : > { %v525_v32 = vadd.f32 %v764_v20, %v524_v29 }
 0x33c   : > { %v529_v35 = vsel %vm528_vm14, %v764_v20, %v525_v32 }
 0x33d   : > { %v534_v36 = vsel %vm531_vm15, %v533_v34, %v529_v35 }
 0x33e   : > { %v536_v37 = vmul.f32 %v1098_v58, %v534_v36 }
 0x340   : > { %699 = vmatmul.msk.f32.gmra.mxu3 %vm488_vm7, %v536_v37 }
 0x3bb   : > { %v560_v38 = vpop.f32.mrf.mxu3 }
 0x3bc   : > { %602 = vmatmul.f32.vlgmr.msrb.gmra.mxu3 %v560_v38 }
 0x3c3   : > { %v563_v39 = vpop.f32.mrf.mxu3 }
 0x3c4   : > { %605 = vmatmul.f32.gmra.mxu3 %v563_v39 }
 0x43f   : > { %v603_v41 = vpop.f32.mrf.mxu3 }
 0x440   : > { %v604_v42 = vadd.f32 %v752_v40, %v603_v41 }
 0x442   : > { %v609_v43 = vadd.f32 %v604_v42, %v924_v0 }
 0x444   : > { %611 = vst [vmem:[%s271_s17] sm:$0xff] %v609_v43 }
 0x447   : > { %v606_v44 = vpop.f32.mrf.mxu3 }
 0x448   : > { %v607_v45 = vadd.f32 %v752_v40, %v606_v44 }
 0x44a   : > { %v610_v46 = vadd.f32 %v607_v45, %v927_v1 }
 0x44c   : > { %612 = vst [vmem:[%s271_s17 + $0x8] sm:$0xff] %v610_v46 }
 0x44d   : > { %792 = shalt.err (!%p789_p3)
}
 0x44e   : > { %s829_s9 = smov 128   ;;  %s830_s17 = smov 8  }
 0x44f   : > { %709 = dma.vmem_to_hbm [thread:$0]  (%p909_p5), %s627_s21, 256, %s629_s22, %s614_s23, %s829_s9, %s829_s9, %s830_s17  }
 0x450 PF: > { %p715_p4 = scmp.ge.s32.totalorder %s827_s27, 2  ;;  %s643_s18 = sand.u32 1, %s815_s24  }
 0x451   : > { %s644_s19 = scalar_lea.sflag [#allocation3], %s643_s18 }
 0x452   : > { %p712_p7 = pnand %p715_p4, %p913_p6 }
 0x454   : > { %p713_p8 = pneg %p712_p7 }
 0x456   : > { %810 = dma.done.wait (%p713_p8), %s644_s19, 256  }
 0x457   : > { %812 = vsyncadd (%p713_p8), %s644_s19, 4294967040  ;;  %p17_p9 = scmp.ge.s32.totalorder %s896_s30, 10   ;;  %s1200_s24 = smov %s819_s25 }
 0x458   : > { %s1201_s25 = smov %s823_s26  ;;  %s1202_s26 = smov %s907_s10 }
 0x459   : > { %s1203_s27 = smov %s896_s30  ;;  %19 = sbr.rel (!%p17_p9) target bundleno = 3 (0x3), region = 83 }
 0x45e   :  { %650 = vsyncpa [#allocation3], 1 }
 0x45f   :  { %652 = vsyncpa [#allocation3 + $0x1], 1 }

</bundles_post_ra>
